<compile_context>
chip_gen: v7x
topology: tpu7x:2x2x1
jax: 0.10.0
libtpu: 0.0.40
codegen_flags: <defaults>
</compile_context>

<pallas_src>
import jax
import jax.numpy as jnp
from jax.experimental import pallas as pl
from jax.experimental.pallas import tpu as pltpu


def _projector_kernel(x2d_ref, stats_ref, w0x_ref, w0s_ref, b0_ref, *rest):
    """rest = [W_mid0, b_mid0, W_mid1, b_mid1, ..., W_last, out].

    x2d   : (B, S*E)   flattened input series
    w0x   : (S*E, H0)  first Linear conv-half with the circular conv folded in
    stats : (B, E)
    w0s   : (E, H0)    first Linear stats-half
    """
    *mid_refs, wlast_ref, o_ref = rest

    # --- first Linear over cat([series_conv(x), stats]) without materializing
    #     either the conv output or the concatenation ---
    h = (jnp.dot(x2d_ref[...], w0x_ref[...], preferred_element_type=jnp.float32)
         + jnp.dot(stats_ref[...], w0s_ref[...], preferred_element_type=jnp.float32)
         + b0_ref[...])
    h = jnp.maximum(h, 0.0)                                    # ReLU

    # --- remaining hidden Linear+ReLU layers (static unroll) ---
    for i in range(0, len(mid_refs), 2):
        h = jnp.maximum(
            jnp.dot(h, mid_refs[i][...], preferred_element_type=jnp.float32)
            + mid_refs[i + 1][...],
            0.0)

    # --- final projection (no bias) ---
    o_ref[...] = jnp.dot(h, wlast_ref[...],
                         preferred_element_type=jnp.float32).astype(o_ref.dtype)


def _full_spec(shape):
    zeros = (0,) * len(shape)
    return pl.BlockSpec(shape, lambda i, z=zeros: z)


def projector(x, stats, conv_w, weights, biases):
    """Fused Projector forward.

    x       : (B, seq_len, enc_in)
    stats   : (B, 1, enc_in)
    conv_w  : (1, seq_len, 3)             PyTorch Conv1d weight (out=1, in=seq_len, k)
    weights : [W0 (H0, 2E), W1 (H1, H0), ..., W_last (out_dim, H_last)]  (PyTorch layout)
    biases  : [b0, b1, ..., b_{n-2}]      (last Linear has no bias)
    """
    B, S, E = x.shape
    f32 = jnp.float32

    # ---- wrapper-side layout plumbing (tiny, B-independent weight prep) ----
    x2d = x.astype(f32).reshape(B, S * E)                       # (B, S*E)
    stats2 = stats.astype(f32).reshape(B, E)                    # (B, E)

    # First Linear: split the (2E -> H0) weight into conv-half and stats-half.
    w0t = weights[0].astype(f32).T                              # (2E, H0)
    w0a, w0s = w0t[:E], w0t[E:]                                 # (E, H0) each
    b0 = biases[0].astype(f32).reshape(1, -1)                   # (1, H0)

    # Fold the circular Conv1d(seq_len -> 1, k=3, pad=1 circular, no bias) into
    # the conv-half of the first Linear:
    #   sum_e conv[b,e] * W0a[e,h]
    #     = sum_{s,e'} x[b,s,e'] * ( w[s,0]*W0a[(e'+1)%E,h]
    #                              + w[s,1]*W0a[e',h]
    #                              + w[s,2]*W0a[(e'-1)%E,h] )
    w_sk = conv_w[0].astype(f32)                                # (S, 3)
    w0a_m1 = jnp.roll(w0a, -1, axis=0)                          # W0a[(e+1)%E]
    w0a_p1 = jnp.roll(w0a, 1, axis=0)                           # W0a[(e-1)%E]
    weff = (w_sk[:, 0, None, None] * w0a_m1[None]
            + w_sk[:, 1, None, None] * w0a[None]
            + w_sk[:, 2, None, None] * w0a_p1[None])            # (S, E, H0)
    w0x = weff.reshape(S * E, -1)                               # (S*E, H0)

    mids = []
    for W, b in zip(weights[1:-1], biases[1:]):
        mids.append(W.astype(f32).T)                            # (K, N)
        mids.append(b.astype(f32).reshape(1, -1))               # (1, N)
    wlast = weights[-1].astype(f32).T                           # (H_last, out_dim)
    out_dim = wlast.shape[1]

    operands = [x2d, stats2, w0x, w0s, b0] + mids + [wlast]
    in_specs = [_full_spec(op.shape) for op in operands]

    return pl.pallas_call(
        _projector_kernel,
        out_shape=jax.ShapeDtypeStruct((B, out_dim), f32),
        grid=(1,),
        in_specs=in_specs,
        out_specs=pl.BlockSpec((B, out_dim), lambda i: (0, 0)),
        compiler_params=pltpu.CompilerParams(
            dimension_semantics=("arbitrary",)),
    )(*operands)


def ref_forward(x, stats, conv_w, weights, biases):
    """Pure-JAX reference mirroring the PyTorch module step by step."""
    B, S, E = x.shape
    hp = jax.lax.Precision.HIGHEST
    # circular pad 1 along the last (length) axis, conv over seq_len channels
    xpad = jnp.concatenate([x[:, :, -1:], x, x[:, :, :1]], axis=-1)    # (B, S, E+2)
    conv = sum(jnp.einsum('bse,s->be', xpad[:, :, k:k + E], conv_w[0, :, k],
                          precision=hp)
               for k in range(3))                                      # (B, E)
    z = jnp.concatenate([conv[:, None, :], stats], axis=1)             # (B, 2, E)
    h = z.reshape(B, -1)                                               # (B, 2E)
    for W, b in zip(weights[:-1], biases):
        h = jnp.maximum(jnp.dot(h, W.T, precision=hp) + b, 0.0)
    return jnp.dot(h, weights[-1].T, precision=hp)


if __name__ == "__main__":
    key = jax.random.PRNGKey(0)
    B, S, E = 2, 8, 16                     # batch, seq_len, enc_in
    hidden_dims = [32, 32]
    hidden_layers = 2
    out_dim = 4

    keys = jax.random.split(key, 16)
    x = jax.random.normal(keys[0], (B, S, E), jnp.float32)
    stats = jax.random.normal(keys[1], (B, 1, E), jnp.float32)

    # Conv1d(seq_len -> 1, k=3, bias=False); PyTorch default init bound = 1/sqrt(fan_in)
    cbound = 1.0 / (S * 3) ** 0.5
    conv_w = jax.random.uniform(keys[2], (1, S, 3), jnp.float32, -cbound, cbound)

    # Backbone: Linear(2E, h0)+ReLU, Linear(h0, h1)+ReLU, Linear(h1, out, bias=False)
    dims = [2 * E] + hidden_dims + [out_dim]
    weights, biases = [], []
    for li in range(len(dims) - 1):
        bnd = 1.0 / dims[li] ** 0.5
        W = jax.random.uniform(keys[3 + 2 * li], (dims[li + 1], dims[li]),
                               jnp.float32, -bnd, bnd)
        weights.append(W)
        if li < len(dims) - 2:          # last Linear has no bias
            b = jax.random.uniform(keys[4 + 2 * li], (dims[li + 1],),
                                   jnp.float32, -bnd, bnd)
            biases.append(b)

    out = jax.block_until_ready(projector(x, stats, conv_w, weights, biases))
    ref = ref_forward(x, stats, conv_w, weights, biases)

    assert out.shape == (B, out_dim), out.shape
    max_err = float(jnp.max(jnp.abs(out - ref)))
    assert jnp.allclose(out, ref, atol=1e-3, rtol=1e-3), max_err
    print("KERNEL_OK")
</pallas_src>

<mosaic_0001>
module attributes {stable_mosaic.version = 11 : i64} {
  func.func @_projector_kernel(%arg0: i32, %arg1: memref<2x128xf32, #tpu.memory_space<vmem>>, %arg2: memref<2x16xf32, #tpu.memory_space<vmem>>, %arg3: memref<128x32xf32, #tpu.memory_space<vmem>>, %arg4: memref<16x32xf32, #tpu.memory_space<vmem>>, %arg5: memref<1x32xf32, #tpu.memory_space<vmem>>, %arg6: memref<32x32xf32, #tpu.memory_space<vmem>>, %arg7: memref<1x32xf32, #tpu.memory_space<vmem>>, %arg8: memref<32x4xf32, #tpu.memory_space<vmem>>, %arg9: memref<2x4xf32, #tpu.memory_space<vmem>>) attributes {dimension_semantics = [#tpu.dimension_semantics<arbitrary>], iteration_bounds = array<i64: 1>, scalar_prefetch = 0 : i64, scratch_operands = 0 : i64, tpu.core_type = #tpu.core_type<tc>, window_params = [{pipeline_mode = #tpu.pipeline_mode<synchronous>, transform_indices = @transform_0, window_bounds = array<i64: 2, 128>}, {pipeline_mode = #tpu.pipeline_mode<synchronous>, transform_indices = @transform_1, window_bounds = array<i64: 2, 16>}, {pipeline_mode = #tpu.pipeline_mode<synchronous>, transform_indices = @transform_2, window_bounds = array<i64: 128, 32>}, {pipeline_mode = #tpu.pipeline_mode<synchronous>, transform_indices = @transform_3, window_bounds = array<i64: 16, 32>}, {pipeline_mode = #tpu.pipeline_mode<synchronous>, transform_indices = @transform_4, window_bounds = array<i64: 1, 32>}, {pipeline_mode = #tpu.pipeline_mode<synchronous>, transform_indices = @transform_5, window_bounds = array<i64: 32, 32>}, {pipeline_mode = #tpu.pipeline_mode<synchronous>, transform_indices = @transform_6, window_bounds = array<i64: 1, 32>}, {pipeline_mode = #tpu.pipeline_mode<synchronous>, transform_indices = @transform_7, window_bounds = array<i64: 32, 4>}, {pipeline_mode = #tpu.pipeline_mode<synchronous>, transform_indices = @transform_8, window_bounds = array<i64: 2, 4>}]} {
    %c0 = arith.constant 0 : index
    %c0_0 = arith.constant 0 : index
    %0 = vector.load %arg1[%c0, %c0_0] : memref<2x128xf32, #tpu.memory_space<vmem>>, vector<2x128xf32>
    %c0_1 = arith.constant 0 : index
    %c0_2 = arith.constant 0 : index
    %1 = vector.load %arg3[%c0_1, %c0_2] : memref<128x32xf32, #tpu.memory_space<vmem>>, vector<128x32xf32>
    %cst = arith.constant dense<0.000000e+00> : vector<2x32xf32>
    %2 = tpu.matmul %0, %1, %cst {dimension_numbers = #tpu.dot_dimension_numbers<[1], [0], [0], [1], [0, 0, 1, 1], [], []>} : vector<2x128xf32>, vector<128x32xf32>, vector<2x32xf32> -> vector<2x32xf32>
    %c0_3 = arith.constant 0 : index
    %c0_4 = arith.constant 0 : index
    %3 = vector.load %arg2[%c0_3, %c0_4] : memref<2x16xf32, #tpu.memory_space<vmem>>, vector<2x16xf32>
    %c0_5 = arith.constant 0 : index
    %c0_6 = arith.constant 0 : index
    %4 = vector.load %arg4[%c0_5, %c0_6] : memref<16x32xf32, #tpu.memory_space<vmem>>, vector<16x32xf32>
    %cst_7 = arith.constant dense<0.000000e+00> : vector<2x32xf32>
    %5 = tpu.matmul %3, %4, %cst_7 {dimension_numbers = #tpu.dot_dimension_numbers<[1], [0], [0], [1], [0, 0, 1, 1], [], []>} : vector<2x16xf32>, vector<16x32xf32>, vector<2x32xf32> -> vector<2x32xf32>
    %6 = arith.addf %2, %5 : vector<2x32xf32>
    %c0_8 = arith.constant 0 : index
    %c0_9 = arith.constant 0 : index
    %7 = vector.load %arg5[%c0_8, %c0_9] : memref<1x32xf32, #tpu.memory_space<vmem>>, vector<1x32xf32>
    %8 = vector.broadcast %7 : vector<1x32xf32> to vector<2x32xf32>
    %9 = arith.addf %6, %8 : vector<2x32xf32>
    %cst_10 = arith.constant 0.000000e+00 : f32
    %10 = vector.broadcast %cst_10 : f32 to vector<2x32xf32>
    %11 = arith.maximumf %9, %10 : vector<2x32xf32>
    %c0_11 = arith.constant 0 : index
    %c0_12 = arith.constant 0 : index
    %12 = vector.load %arg6[%c0_11, %c0_12] : memref<32x32xf32, #tpu.memory_space<vmem>>, vector<32x32xf32>
    %cst_13 = arith.constant dense<0.000000e+00> : vector<2x32xf32>
    %13 = tpu.matmul %11, %12, %cst_13 {dimension_numbers = #tpu.dot_dimension_numbers<[1], [0], [0], [1], [0, 0, 1, 1], [], []>} : vector<2x32xf32>, vector<32x32xf32>, vector<2x32xf32> -> vector<2x32xf32>
    %c0_14 = arith.constant 0 : index
    %c0_15 = arith.constant 0 : index
    %14 = vector.load %arg7[%c0_14, %c0_15] : memref<1x32xf32, #tpu.memory_space<vmem>>, vector<1x32xf32>
    %15 = vector.broadcast %14 : vector<1x32xf32> to vector<2x32xf32>
    %16 = arith.addf %13, %15 : vector<2x32xf32>
    %cst_16 = arith.constant 0.000000e+00 : f32
    %17 = vector.broadcast %cst_16 : f32 to vector<2x32xf32>
    %18 = arith.maximumf %16, %17 : vector<2x32xf32>
    %c0_17 = arith.constant 0 : index
    %c0_18 = arith.constant 0 : index
    %19 = vector.load %arg8[%c0_17, %c0_18] : memref<32x4xf32, #tpu.memory_space<vmem>>, vector<32x4xf32>
    %cst_19 = arith.constant dense<0.000000e+00> : vector<2x4xf32>
    %20 = tpu.matmul %18, %19, %cst_19 {dimension_numbers = #tpu.dot_dimension_numbers<[1], [0], [0], [1], [0, 0, 1, 1], [], []>} : vector<2x32xf32>, vector<32x4xf32>, vector<2x4xf32> -> vector<2x4xf32>
    %c0_20 = arith.constant 0 : index
    %c0_21 = arith.constant 0 : index
    %21 = vector.load %arg9[%c0_20, %c0_21] : memref<2x4xf32, #tpu.memory_space<vmem>>, vector<2x4xf32>
    tpu.vector_store %arg9[%c0_20, %c0_21], %20 {strides = array<i32>} : memref<2x4xf32, #tpu.memory_space<vmem>>, vector<2x4xf32>,
    return
  }
  func.func @transform_0(%arg0: i32) -> (i32, i32) {
    %c0_i32 = arith.constant 0 : i32
    %c0_i32_0 = arith.constant 0 : i32
    %c0_i32_1 = arith.constant 0 : i32
    return %c0_i32, %c0_i32_0 : i32, i32
  }
  func.func @transform_1(%arg0: i32) -> (i32, i32) {
    %c0_i32 = arith.constant 0 : i32
    %c0_i32_0 = arith.constant 0 : i32
    %c0_i32_1 = arith.constant 0 : i32
    return %c0_i32, %c0_i32_0 : i32, i32
  }
  func.func @transform_2(%arg0: i32) -> (i32, i32) {
    %c0_i32 = arith.constant 0 : i32
    %c0_i32_0 = arith.constant 0 : i32
    %c0_i32_1 = arith.constant 0 : i32
    return %c0_i32, %c0_i32_0 : i32, i32
  }
  func.func @transform_3(%arg0: i32) -> (i32, i32) {
    %c0_i32 = arith.constant 0 : i32
    %c0_i32_0 = arith.constant 0 : i32
    %c0_i32_1 = arith.constant 0 : i32
    return %c0_i32, %c0_i32_0 : i32, i32
  }
  func.func @transform_4(%arg0: i32) -> (i32, i32) {
    %c0_i32 = arith.constant 0 : i32
    %c0_i32_0 = arith.constant 0 : i32
    %c0_i32_1 = arith.constant 0 : i32
    return %c0_i32, %c0_i32_0 : i32, i32
  }
  func.func @transform_5(%arg0: i32) -> (i32, i32) {
    %c0_i32 = arith.constant 0 : i32
    %c0_i32_0 = arith.constant 0 : i32
    %c0_i32_1 = arith.constant 0 : i32
    return %c0_i32, %c0_i32_0 : i32, i32
  }
  func.func @transform_6(%arg0: i32) -> (i32, i32) {
    %c0_i32 = arith.constant 0 : i32
    %c0_i32_0 = arith.constant 0 : i32
    %c0_i32_1 = arith.constant 0 : i32
    return %c0_i32, %c0_i32_0 : i32, i32
  }
  func.func @transform_7(%arg0: i32) -> (i32, i32) {
    %c0_i32 = arith.constant 0 : i32
    %c0_i32_0 = arith.constant 0 : i32
    %c0_i32_1 = arith.constant 0 : i32
    return %c0_i32, %c0_i32_0 : i32, i32
  }
  func.func @transform_8(%arg0: i32) -> (i32, i32) {
    %c0_i32 = arith.constant 0 : i32
    %c0_i32_0 = arith.constant 0 : i32
    %c0_i32_1 = arith.constant 0 : i32
    return %c0_i32, %c0_i32_0 : i32, i32
  }
}

</mosaic_0001>

<bundles_post_ra>
// kernel: tpu_custom_call.1
= control target key start
LH: loop header
LB: loop body
LE: loop exit
PB: predicated region body
PF: predicated region fallthrough
CT: control target
= control target key end

     0   :  { %v548_v3 = vmov 0.0|0.0   ;;  %vm549_vm0 = vmmov 0   ;;  %v550_v6 = vmov 0.0   ;;  %s722_s0 = inlined_call_operand.vmem [shape: f32[2,128], index: 0, kind: input, shape index: {}]   ;;  %s723_s1 = inlined_call_operand.vmem [shape: f32[2,16], index: 1, kind: input, shape index: {}]   ;;  %s724_s2 = inlined_call_operand.vmem [shape: f32[128,32], index: 2, kind: input, shape index: {}]   ;;  %s725_s3 = inlined_call_operand.vmem [shape: f32[16,32], index: 3, kind: input, shape index: {}]   ;;  %s726_s4 = inlined_call_operand.vmem [shape: f32[1,32], index: 4, kind: input, shape index: {}]   ;;  %s727_s5 = inlined_call_operand.vmem [shape: f32[32,32], index: 5, kind: input, shape index: {}]   ;;  %s728_s6 = inlined_call_operand.vmem [shape: f32[1,32], index: 6, kind: input, shape index: {}]   ;;  %s729_s7 = inlined_call_operand.vmem [shape: f32[32,4], index: 7, kind: input, shape index: {}]   ;;  %s730_s8 = inlined_call_operand.hbm [shape: f32[2,4], index: 8, kind: output, shape index: {}]  }
   0x1   :  { %v31_v0 = vld [vmem:[%s724_s2] sm:$0xff]  ;;  %v32_v1 = vld [vmem:[%s724_s2 + $0x8] sm:$0xff]  ;;  %v33_v2 = vld [vmem:[%s724_s2 + $0x10] sm:$0xff]  ;;  %484 = vmatprep.subr.bf16.mxu1 %v548_v3  ;;  %481 = vmatprep.subr.bf16.mxu0 %v548_v3 }
   0x2   :  { %v485_v4 = vpack.c.bf16 %v32_v1, %v31_v0  ;;  %v34_v5 = vld [vmem:[%s724_s2 + $0x18] sm:$0xff]  ;;  %421 = vmatprep.mubr.msk.f32.mxu0 %vm549_vm0, %v550_v6  ;;  %456 = vmatprep.mubr.msk.f32.mxu1 %vm549_vm0, %v550_v6  ;;  %v35_v8 = vld [vmem:[%s724_s2 + $0x20] sm:$0xff]  ;;  %v36_v9 = vld [vmem:[%s724_s2 + $0x28] sm:$0xff] }
   0x3   :  { %v488_v7 = vpack.c.bf16 %v34_v5, %v33_v2  ;;  %v48_v10 = vld [vmem:[%s725_s3] sm:$0xff]  ;;  %v49_v11 = vld [vmem:[%s725_s3 + $0x8] sm:$0xff] }
   0x4   :  { %486 = vmatpush3.bf16.msra.mxu1 %v485_v4  ;;  %v482_v12 = vpack.c.bf16 %v49_v11, %v48_v10 }
   0x5   :  { %487 = vmatprep.subr.bf16.mxu1 %v548_v3 }
   0x6   :  { %13 = vsyncpa [#allocation3], 0  ;;  %v491_v13 = vpack.c.bf16 %v36_v9, %v35_v8  ;;  %v37_v14 = vld [vmem:[%s724_s2 + $0x30] sm:$0xff]  ;;  %v38_v15 = vld [vmem:[%s724_s2 + $0x38] sm:$0xff]  ;;  %483 = vmatpush3.bf16.msra.mxu0 %v482_v12  ;;  %vm50_vm1 = vcmask 130048   ;;  %vm214_vm2 = vcmask 261120  }
   0x7   :  { %v47_v16 = vld [vmem:[%s723_s1] sm:$0x3]  ;;  %508 = vmatprep.subr.bf16.mxu0 %v548_v3  ;;  %v494_v17 = vpack.c.bf16 %v38_v15, %v37_v14  ;;  %v40_v19 = vld [vmem:[%s724_s2 + $0x48] sm:$0xff]  ;;  %v41_v21 = vld [vmem:[%s724_s2 + $0x50] sm:$0xff]  ;;  %s551_s13 = smov [#allocation2]   ;;  %vm366_vm3 = vcmask 25600  }
   0x8   :  { %489 = vmatpush3.bf16.msra.mxu1 %v488_v7  ;;  %v39_v18 = vld [vmem:[%s724_s2 + $0x40] sm:$0xff]  ;;  %v42_v22 = vld [vmem:[%s724_s2 + $0x58] sm:$0xff]  ;;  %v44_v25 = vld [vmem:[%s724_s2 + $0x68] sm:$0xff]  ;;  %s374_s14 = sshll.u32 %s551_s13, 4  ;;  %s375_s14 = int_to_ptr.vmem [resolvable:$true] %s374_s14 }
   0x9   :  { %490 = vmatprep.subr.bf16.mxu1 %v548_v3  ;;  %422 = vmatmul.mubr.msk.f32.vlgmr.msra.gmra.mrb[0].mxu0 %vm50_vm1, %v47_v16  ;;  %v497_v20 = vpack.c.bf16 %v40_v19, %v39_v18  ;;  %v500_v23 = vpack.c.bf16 %v42_v22, %v41_v21  ;;  %v43_v24 = vld [vmem:[%s724_s2 + $0x60] sm:$0xff]  ;;  %v45_v27 = vld [vmem:[%s724_s2 + $0x70] sm:$0xff]  ;;  %v46_v28 = vld [vmem:[%s724_s2 + $0x78] sm:$0xff]  ;;  %p529_p1 = scmp.lt.s32.totalorder %s375_s14, %s375_s14 }
   0xa   :  { %467 = vmatprep.mubr.msk.f32.mxu0 %vm549_vm0, %v550_v6  ;;  %v503_v26 = vpack.c.bf16 %v44_v25, %v43_v24  ;;  %v506_v29 = vpack.c.bf16 %v46_v28, %v45_v27  ;;  %v30_v30 = vld [vmem:[%s722_s0] sm:$0x3]  ;;  %v204_v32 = vld [vmem:[%s727_s5 + $0x8] sm:$0xff]  ;;  %v205_v34 = vld [vmem:[%s727_s5 + $0x10] sm:$0xff] }
   0xb   :  { %v203_v31 = vld [vmem:[%s727_s5] sm:$0xff]  ;;  %v206_v35 = vld [vmem:[%s727_s5 + $0x18] sm:$0xff]  ;;  %v290_v44 = vld [vmem:[%s729_s7 + $0x8] sm:$0xff] }
   0xc   :  { %492 = vmatpush3.bf16.msra.mxu1 %v491_v13  ;;  %v509_v33 = vpack.c.bf16 %v204_v32, %v203_v31  ;;  %v512_v36 = vpack.c.bf16 %v206_v35, %v205_v34  ;;  %v383_v40 = vld [vmem:[%s726_s4] ss:$0 sm:$0xff]  ;;  %v291_v48 = vld [vmem:[%s729_s7 + $0x10] sm:$0xff]  ;;  %v292_v49 = vld [vmem:[%s729_s7 + $0x18] sm:$0xff] }
   0xd   :  { %493 = vmatprep.subr.bf16.mxu1 %v548_v3  ;;  %v289_v43 = vld [vmem:[%s729_s7] sm:$0xff]  ;;  %v518_v50 = vpack.c.bf16 %v292_v49, %v291_v48  ;;  %s524_s7 = scalar_lea.vmem %s375_s14, 32 }
   0xe   :  { %510 = vmatpush3.bf16.msra.mxu0 %v509_v33  ;;  %v515_v46 = vpack.c.bf16 %v290_v44, %v289_v43  ;;  %v384_v51 = vld [vmem:[%s728_s6] ss:$0 sm:$0xff]  ;;  %p525_p0 = scmp.ne.s32.totalorder %s375_s14, %s524_s7  ;;  %p530_p2 = scmp.lt.s32.totalorder %s524_s7, %s524_s7 }
   0xf   :  { %511 = vmatprep.subr.bf16.mxu0 %v548_v3 }
  0x10   :  { %495 = vmatpush3.bf16.msra.mxu1 %v494_v17  ;;  %p531_p3 = por %p530_p2, %p529_p1 }
  0x11   :  { %496 = vmatprep.subr.bf16.mxu1 %v548_v3 }
  0x12   :  { %513 = vmatpush3.bf16.msra.mxu0 %v512_v36  ;;  %p532_p4 = pnand %p531_p3, %p525_p0 }
  0x13   :  { %514 = vmatprep.subr.bf16.mxu0 %v548_v3 }
  0x14   :  { %498 = vmatpush3.bf16.msra.mxu1 %v497_v20 }
  0x15   :  { %499 = vmatprep.subr.bf16.mxu1 %v548_v3 }
  0x18   :  { %501 = vmatpush3.bf16.msra.mxu1 %v500_v23 }
  0x19   :  { %502 = vmatprep.subr.bf16.mxu1 %v548_v3 }
  0x1c   :  { %504 = vmatpush3.bf16.msra.mxu1 %v503_v26 }
  0x1d   :  { %505 = vmatprep.subr.bf16.mxu1 %v548_v3 }
  0x20   :  { %507 = vmatpush3.bf16.msra.mxu1 %v506_v29 }
  0x23   :  { %457 = vmatmul.mubr.f32.vlgmr.msra.gmra.mrb[0].mxu1 %v30_v30 }
  0xdc   :  { %v120_v37 = vpop.f32.mrb[0].mxu0 }
  0xdd   :  { %v423_v38 = vpop.f32.mrb[1].mxu0 }
  0xf6   :  { %v190_v39 = vpop.f32.mrb[0].mxu1 }
  0xf7   :  { %v191_v41 = vadd.f32 %v190_v39, %v120_v37  ;;  %v458_v42 = vpop.f32.mrb[1].mxu1 }
  0xf9   :  { %v201_v45 = vadd.f32 %v383_v40, %v191_v41 }
  0xfb   :  { %v202_v47 = vmax.f32 %v201_v45, 0.0 }
  0xfd   :  { %468 = vmatmul.mubr.msk.f32.vlgmr.msra.gmra.mrb[2].mxu0 %vm214_vm2, %v202_v47 }
  0xfe   :  { %516 = vmatpush3.bf16.msra.mxu0 %v515_v46  ;;  %478 = vmatprep.mubr.msk.f32.mxu0 %vm549_vm0, %v550_v6 }
  0xff   :  { %517 = vmatprep.subr.bf16.mxu0 %v548_v3 }
 0x102   :  { %519 = vmatpush3.bf16.msra.mxu0 %v518_v50 }
 0x1d0   :  { %v284_v52 = vpop.f32.mrb[2].mxu0 }
 0x1d1   :  { %v285_v53 = vadd.f32 %v384_v51, %v284_v52  ;;  %v469_v54 = vpop.f32.mrb[3].mxu0 }
 0x1d3   :  { %v288_v55 = vmax.f32 %v285_v53, 0.0 }
 0x1d5   :  { %479 = vmatmul.mubr.msk.f32.vlgmr.msra.gmra.mrb[4].mxu0 %vm214_vm2, %v288_v55 }
 0x2a8   :  { %v362_v56 = vpop.f32.mrb[4].mxu0 }
 0x2a9   :  { %367 = vst.msk [vmem:[#allocation2] sm:$0x3] %vm366_vm3, %v362_v56  ;;  %v480_v57 = vpop.f32.mrb[5].mxu0 }
 0x2aa   :  { %535 = shalt.err (!%p532_p4)
}
 0x2ab   :  { %s536_s16 = scalar_lea.hbm %s730_s8, 32 }
 0x2ac   :  { %p537_p5 = scmp.ne.s32.totalorder %s730_s8, %s536_s16  ;;  %p540_p6 = scmp.lt.u32.totalorder %s536_s16, %s730_s8 }
 0x2ae   :  { %p542_p7 = pnand %p540_p6, %p537_p5 }
 0x2b0   :  { %545 = shalt.err (!%p542_p7)
}
 0x2b1   :  { %377 = dma.vmem_to_hbm [thread:$0]  %s375_s14, 32, %s730_s8, [#allocation3]  }
 0x2b2   :  { %546 = dma.done.wait [#allocation3], 32  }
 0x2b3   :  { %547 = vsyncadd [#allocation3], 4294967264 }
 0x2b4   :  { %381 = vsyncpa [#allocation3], 1 }

</bundles_post_ra>
